<compile_context>
chip_gen: v7x
topology: tpu7x:2x2x1
jax: 0.10.0
libtpu: 0.0.40
codegen_flags: <defaults>
</compile_context>

<pallas_src>
import jax
import jax.numpy as jnp
from jax.experimental import pallas as pl
from jax.experimental.pallas import tpu as pltpu

# ---- shapes of the upstream nn.LSTM output that the module consumes --------
BATCH = 2          # B
SEQ = 8            # T (sequence length)
HIDDEN = 16        # H
NUM_DIRS = 2       # bidirectional LSTM
# out    : (B, T, NUM_DIRS * H)              = (2, 8, 32)   (batch_first=True)
# hidden : (h_n, c_n), each (NUM_DIRS, B, H) = (2, 2, 16)

_VMEM = pl.BlockSpec(memory_space=pltpu.MemorySpace.VMEM)


def _extract_out_kernel(out_ref, o_ref):
    # `out, hidden = x; return out`  ->  pass `out` straight through.
    o_ref[...] = out_ref[...]


def _extract_hidden_kernel(h_ref, c_ref, oh_ref, oc_ref):
    # `return hidden`  ->  pass (h_n, c_n) straight through.
    oh_ref[...] = h_ref[...]
    oc_ref[...] = c_ref[...]


def extract_lstm_output(x, extract_out=True):
    """Forward pass of ExtractLSTMOutput.  x = (out, (h_n, c_n))."""
    out, hidden = x
    if extract_out:
        return pl.pallas_call(
            _extract_out_kernel,
            out_shape=jax.ShapeDtypeStruct(out.shape, out.dtype),
            in_specs=[_VMEM],
            out_specs=_VMEM,
        )(out)
    h_n, c_n = hidden
    return pl.pallas_call(
        _extract_hidden_kernel,
        out_shape=(jax.ShapeDtypeStruct(h_n.shape, h_n.dtype),
                   jax.ShapeDtypeStruct(c_n.shape, c_n.dtype)),
        in_specs=[_VMEM, _VMEM],
        out_specs=(_VMEM, _VMEM),
    )(h_n, c_n)


if __name__ == "__main__":
    key = jax.random.PRNGKey(0)
    k_out, k_h, k_c = jax.random.split(key, 3)

    # Deterministic stand-ins for an nn.LSTM's (out, (h_n, c_n)) tuple.
    out = jax.random.normal(k_out, (BATCH, SEQ, NUM_DIRS * HIDDEN), jnp.float32)
    h_n = jax.random.normal(k_h, (NUM_DIRS, BATCH, HIDDEN), jnp.float32)
    c_n = jax.random.normal(k_c, (NUM_DIRS, BATCH, HIDDEN), jnp.float32)
    x = (out, (h_n, c_n))

    # extract_out=True (module default): returns `out`.
    y = extract_lstm_output(x, extract_out=True)
    jax.block_until_ready(y)
    assert y.shape == out.shape and y.dtype == out.dtype, (y.shape, y.dtype)
    assert bool(jnp.array_equal(y, out))

    # extract_out=False: returns `hidden` = (h_n, c_n).
    yh, yc = extract_lstm_output(x, extract_out=False)
    jax.block_until_ready((yh, yc))
    assert bool(jnp.array_equal(yh, h_n)) and bool(jnp.array_equal(yc, c_n))

    print("KERNEL_OK")
</pallas_src>

<mosaic_0001>
module attributes {stable_mosaic.version = 11 : i64} {
  func.func @_extract_out_kernel(%arg0: memref<2x8x32xf32, #tpu.memory_space<vmem>>, %arg1: memref<2x8x32xf32, #tpu.memory_space<vmem>>) attributes {dimension_semantics = [], scalar_prefetch = 0 : i64, scratch_operands = 0 : i64, tpu.core_type = #tpu.core_type<tc>} {
    %c0 = arith.constant 0 : index
    %c0_0 = arith.constant 0 : index
    %c0_1 = arith.constant 0 : index
    %0 = vector.load %arg0[%c0, %c0_0, %c0_1] : memref<2x8x32xf32, #tpu.memory_space<vmem>>, vector<2x8x32xf32>
    %c0_2 = arith.constant 0 : index
    %c0_3 = arith.constant 0 : index
    %c0_4 = arith.constant 0 : index
    %1 = vector.load %arg1[%c0_2, %c0_3, %c0_4] : memref<2x8x32xf32, #tpu.memory_space<vmem>>, vector<2x8x32xf32>
    tpu.vector_store %arg1[%c0_2, %c0_3, %c0_4], %0 {strides = array<i32>} : memref<2x8x32xf32, #tpu.memory_space<vmem>>, vector<2x8x32xf32>,
    return
  }
}

</mosaic_0001>

<bundles_post_ra>
// kernel: tpu_custom_call.1
= control target key start
LH: loop header
LB: loop body
LE: loop exit
PB: predicated region body
PF: predicated region fallthrough
CT: control target
= control target key end

     0   :  { %6 = vsyncpa [#allocation3], 0  ;;  %s135_s0 = inlined_call_operand.hbm [shape: f32[2,8,32], index: 0, kind: input, shape index: {}]   ;;  %s136_s1 = inlined_call_operand.hbm [shape: f32[2,8,32], index: 1, kind: output, shape index: {}]  }
   0x1   :  { %7 = vsyncpa [#allocation4], 0  ;;  %s97_s6 = smov [#allocation2]   ;;  %s49_s10 = scalar_lea.hbm %s135_s0, 256 }
   0x2   :  { %s13_s7 = sshll.u32 %s97_s6, 4  ;;  %p50_p0 = scmp.ne.s32.totalorder %s135_s0, %s49_s10  ;;  %s14_s7 = int_to_ptr.vmem [resolvable:$true] %s13_s7 }
   0x3   :  { %p53_p1 = scmp.lt.u32.totalorder %s49_s10, %s135_s0 }
   0x5   :  { %p55_p2 = pnand %p53_p1, %p50_p0 }
   0x7   :  { %58 = shalt.err (!%p55_p2)
}
   0x8   :  { %s59_s15 = scalar_lea.vmem %s14_s7, 256  ;;  %p64_p4 = scmp.lt.s32.totalorder %s14_s7, %s14_s7 }
   0x9   :  { %p60_p3 = scmp.ne.s32.totalorder %s14_s7, %s59_s15  ;;  %p65_p5 = scmp.lt.s32.totalorder %s59_s15, %s59_s15 }
   0xb   :  { %p66_p6 = por %p65_p5, %p64_p4 }
   0xd   :  { %p67_p7 = pnand %p66_p6, %p60_p3 }
   0xf   :  { %70 = shalt.err (!%p67_p7)
}
  0x10   :  { %s98_s16 = smov 128   ;;  %s99_s17 = smov 8  }
  0x11   :  { %19 = dma.hbm_to_vmem [thread:$0]  %s135_s0, 256, %s14_s7, [#allocation3], %s98_s16, %s98_s16, %s99_s17  }
  0x12   :  { %93 = dma.done.wait [#allocation3], 256  }
  0x13   :  { %94 = vsyncadd [#allocation3], 4294967040  ;;  %s100_s20 = smov [#allocation5]   ;;  %vm25_vm0 = vcmask 261120   ;;  %v23_v0 = vld [vmem:[#allocation2] sm:$0xff]  ;;  %v24_v1 = vld [vmem:[#allocation2 + $0x8] sm:$0xff] }
  0x14   :  { %s33_s21 = sshll.u32 %s100_s20, 4  ;;  %26 = vst.msk [vmem:[#allocation5] sm:$0xff] %vm25_vm0, %v23_v0  ;;  %27 = vst.msk [vmem:[#allocation5 + $0x8] sm:$0xff] %vm25_vm0, %v24_v1  ;;  %s34_s21 = int_to_ptr.vmem [resolvable:$true] %s33_s21 }
  0x15   :  { %s71_s22 = scalar_lea.vmem %s34_s21, 256  ;;  %p76_p9 = scmp.lt.s32.totalorder %s34_s21, %s34_s21 }
  0x16   :  { %p72_p8 = scmp.ne.s32.totalorder %s34_s21, %s71_s22  ;;  %p77_p10 = scmp.lt.s32.totalorder %s71_s22, %s71_s22 }
  0x18   :  { %p78_p11 = por %p77_p10, %p76_p9 }
  0x1a   :  { %p79_p12 = pnand %p78_p11, %p72_p8 }
  0x1c   :  { %82 = shalt.err (!%p79_p12)
}
  0x1d   :  { %s83_s0 = scalar_lea.hbm %s136_s1, 256 }
  0x1e   :  { %p84_p13 = scmp.ne.s32.totalorder %s136_s1, %s83_s0  ;;  %p87_p0 = scmp.lt.u32.totalorder %s83_s0, %s136_s1 }
  0x20   :  { %p89_p1 = pnand %p87_p0, %p84_p13 }
  0x22   :  { %92 = shalt.err (!%p89_p1)
}
  0x23   :  { %39 = dma.vmem_to_hbm [thread:$0]  %s34_s21, 256, %s136_s1, [#allocation4], %s98_s16, %s98_s16, %s99_s17  }
  0x24   :  { %95 = dma.done.wait [#allocation4], 256  }
  0x25   :  { %96 = vsyncadd [#allocation4], 4294967040 }
  0x26   :  { %43 = vsyncpa [#allocation3], 1 }
  0x27   :  { %44 = vsyncpa [#allocation4], 1 }

</bundles_post_ra>
